<compile_context>
chip_gen: v5e
topology: v5e:2x2
jax: 0.10.0
libtpu: 0.0.40
codegen_flags: <defaults>
</compile_context>

<pallas_src>
import functools

import jax
import jax.numpy as jnp
from jax.experimental import pallas as pl
from jax.experimental.pallas import tpu as pltpu

LANE = 128


def _round_up(x, m):
    return (x + m - 1) // m * m


def _critic_kernel(n_layers, x_ref, *refs):
    """Fused MLP forward on one (TILE_B, in_dim_pad) batch tile.

    refs = (w0, b0, w1, b1, ..., w_{L-1}, b_{L-1}, out_ref).
    Weights are bf16 (in_pad, out_pad); biases are f32 (1, out_pad).
    Hidden layers apply ReLU; the last (padded-to-128-wide) layer does not.
    """
    out_ref = refs[-1]
    p = refs[:-1]

    h = x_ref[...]                                       # bf16 (TILE_B, in_pad)
    for i in range(n_layers):
        w = p[2 * i][...]                                # bf16 (in_pad, out_pad)
        b = p[2 * i + 1][...]                            # f32  (1, out_pad)
        acc = jnp.dot(h, w, preferred_element_type=jnp.float32) + b
        if i < n_layers - 1:
            h = jnp.maximum(acc, 0.0).astype(jnp.bfloat16)
        else:
            out_ref[...] = acc                           # f32, lane-dense store


def prepare_params(params):
    """Zero-pad every Linear to lane multiples of 128 and cast weights to bf16.

    params: list of (W(in, out) f32, b(1, out) f32) -- weights stored transposed
    relative to PyTorch's nn.Linear (out, in). Done once, outside the hot path.
    """
    prepped = []
    for w, b in params:
        din, dout = w.shape
        din_p, dout_p = _round_up(din, LANE), _round_up(dout, LANE)
        w_p = jnp.pad(jnp.asarray(w, jnp.bfloat16),
                      ((0, din_p - din), (0, dout_p - dout)))
        b_p = jnp.pad(jnp.asarray(b, jnp.float32), ((0, 0), (0, dout_p - dout)))
        prepped.append((w_p, b_p))
    return prepped


@functools.partial(jax.jit, static_argnames=("tile_b",))
def critic_forward(s, prepped_params, a=None, *, tile_b=256):
    """JAX wrapper reproducing Critic.forward semantics on padded bf16 params."""
    s = jnp.asarray(s, jnp.float32)
    batch = s.shape[0]
    x = s.reshape(batch, -1)
    if a is not None:
        a = jnp.asarray(a, jnp.float32)
        x = jnp.concatenate([x, a.reshape(batch, -1)], axis=1)

    in_dim = x.shape[1]
    in_dim_pad = prepped_params[0][0].shape[0]
    out_dim_pad = prepped_params[-1][0].shape[1]
    assert in_dim <= in_dim_pad, (in_dim, in_dim_pad)

    # Batch tile: multiple of 128 (full MXU M, clean bf16 sublane tiling), capped.
    tile_b = min(tile_b, _round_up(batch, LANE))
    batch_pad = _round_up(batch, tile_b)

    # concat + pad + cast fuse under jit into one producer fusion.
    x_p = jnp.pad(x.astype(jnp.bfloat16),
                  ((0, batch_pad - batch), (0, in_dim_pad - in_dim)))

    flat = []
    for w, b in prepped_params:
        flat += [w, b]
    n_layers = len(prepped_params)

    in_specs = [pl.BlockSpec((tile_b, in_dim_pad), lambda i: (i, 0))]
    for w, b in prepped_params:
        in_specs.append(pl.BlockSpec(w.shape, lambda i: (0, 0)))  # VMEM-resident
        in_specs.append(pl.BlockSpec(b.shape, lambda i: (0, 0)))  # VMEM-resident

    out = pl.pallas_call(
        functools.partial(_critic_kernel, n_layers),
        out_shape=jax.ShapeDtypeStruct((batch_pad, out_dim_pad), jnp.float32),
        grid=(batch_pad // tile_b,),
        in_specs=in_specs,
        out_specs=pl.BlockSpec((tile_b, out_dim_pad), lambda i: (i, 0)),
        compiler_params=pltpu.CompilerParams(
            dimension_semantics=("parallel",)),
    )(x_p, *flat)

    # Column 0 of the lane-dense (…,128) output is the real (batch, 1) result.
    return out[:batch, :1]


def init_critic_params(key, in_dim, layer):
    """Deterministic synthetic init mirroring nn.Linear shapes.

    Layers: in_dim -> layer[0] -> ... -> layer[-1] -> 1.
    Weights stored transposed relative to PyTorch: (in_features, out_features).
    """
    dims = [in_dim] + list(layer) + [1]
    params = []
    for i in range(len(dims) - 1):
        fan_in, fan_out = dims[i], dims[i + 1]
        key, kw, kb = jax.random.split(key, 3)
        bound = 1.0 / jnp.sqrt(jnp.float32(fan_in))
        w = jax.random.uniform(kw, (fan_in, fan_out), jnp.float32, -bound, bound)
        b = jax.random.uniform(kb, (1, fan_out), jnp.float32, -bound, bound)
        params.append((w, b))
    return params


def critic_reference(s, params, a=None):
    """Pure-JAX reference with the kernel's numerics (bf16 matmul inputs,
    f32 accumulation, f32 bias-add / ReLU)."""
    s = jnp.asarray(s, jnp.float32)
    batch = s.shape[0]
    x = s.reshape(batch, -1)
    if a is not None:
        x = jnp.concatenate(
            [x, jnp.asarray(a, jnp.float32).reshape(batch, -1)], axis=1)
    x = x.astype(jnp.bfloat16)
    n = len(params)
    for i, (w, b) in enumerate(params):
        acc = jnp.dot(x, jnp.asarray(w, jnp.bfloat16),
                      preferred_element_type=jnp.float32)
        acc = acc + jnp.asarray(b, jnp.float32)
        if i < n - 1:
            x = jnp.maximum(acc, 0.0).astype(jnp.bfloat16)
        else:
            return acc


if __name__ == "__main__":
    key = jax.random.PRNGKey(0)

    # Small shapes consistent with the module's forward:
    batch = 8
    state_shape = (4, 4, 4)   # prod = 64
    action_shape = (8,)       # prod = 8
    layer = [32, 32, 16]      # small stand-in for the module default [512, 512, 128]
    in_dim = 4 * 4 * 4 + 8

    key, ks, ka, kp = jax.random.split(key, 4)
    s = jax.random.normal(ks, (batch,) + state_shape, dtype=jnp.float32)
    a = jax.random.normal(ka, (batch,) + action_shape, dtype=jnp.float32)
    params = init_critic_params(kp, in_dim, layer)
    prepped = prepare_params(params)

    out = critic_forward(s, prepped, a)
    out = jax.block_until_ready(out)

    ref = critic_reference(s, params, a=a)
    assert out.shape == (batch, 1), out.shape
    assert jnp.allclose(out, ref, atol=2e-3, rtol=2e-3), (out, ref)

    print("KERNEL_OK")
</pallas_src>

<mosaic_0001>
module attributes {stable_mosaic.version = 11 : i64} {
  func.func @_critic_kernel(%arg0: i32, %arg1: memref<128x128xbf16, #tpu.memory_space<vmem>>, %arg2: memref<128x128xbf16, #tpu.memory_space<vmem>>, %arg3: memref<1x128xf32, #tpu.memory_space<vmem>>, %arg4: memref<128x128xbf16, #tpu.memory_space<vmem>>, %arg5: memref<1x128xf32, #tpu.memory_space<vmem>>, %arg6: memref<128x128xbf16, #tpu.memory_space<vmem>>, %arg7: memref<1x128xf32, #tpu.memory_space<vmem>>, %arg8: memref<128x128xbf16, #tpu.memory_space<vmem>>, %arg9: memref<1x128xf32, #tpu.memory_space<vmem>>, %arg10: memref<128x128xf32, #tpu.memory_space<vmem>>) attributes {dimension_semantics = [#tpu.dimension_semantics<parallel>], iteration_bounds = array<i64: 1>, scalar_prefetch = 0 : i64, scratch_operands = 0 : i64, tpu.core_type = #tpu.core_type<tc>, window_params = [{transform_indices = @transform_0, window_bounds = array<i64: 128, 128>}, {pipeline_mode = #tpu.pipeline_mode<synchronous>, transform_indices = @transform_1, window_bounds = array<i64: 128, 128>}, {pipeline_mode = #tpu.pipeline_mode<synchronous>, transform_indices = @transform_2, window_bounds = array<i64: 1, 128>}, {pipeline_mode = #tpu.pipeline_mode<synchronous>, transform_indices = @transform_3, window_bounds = array<i64: 128, 128>}, {pipeline_mode = #tpu.pipeline_mode<synchronous>, transform_indices = @transform_4, window_bounds = array<i64: 1, 128>}, {pipeline_mode = #tpu.pipeline_mode<synchronous>, transform_indices = @transform_5, window_bounds = array<i64: 128, 128>}, {pipeline_mode = #tpu.pipeline_mode<synchronous>, transform_indices = @transform_6, window_bounds = array<i64: 1, 128>}, {pipeline_mode = #tpu.pipeline_mode<synchronous>, transform_indices = @transform_7, window_bounds = array<i64: 128, 128>}, {pipeline_mode = #tpu.pipeline_mode<synchronous>, transform_indices = @transform_8, window_bounds = array<i64: 1, 128>}, {transform_indices = @transform_9, window_bounds = array<i64: 128, 128>}]} {
    %c0 = arith.constant 0 : index
    %c0_0 = arith.constant 0 : index
    %0 = vector.load %arg1[%c0, %c0_0] : memref<128x128xbf16, #tpu.memory_space<vmem>>, vector<128x128xbf16>
    %c0_1 = arith.constant 0 : index
    %c0_2 = arith.constant 0 : index
    %1 = vector.load %arg2[%c0_1, %c0_2] : memref<128x128xbf16, #tpu.memory_space<vmem>>, vector<128x128xbf16>
    %c0_3 = arith.constant 0 : index
    %c0_4 = arith.constant 0 : index
    %2 = vector.load %arg3[%c0_3, %c0_4] : memref<1x128xf32, #tpu.memory_space<vmem>>, vector<1x128xf32>
    %cst = arith.constant dense<0.000000e+00> : vector<128x128xf32>
    %3 = tpu.matmul %0, %1, %cst {dimension_numbers = #tpu.dot_dimension_numbers<[1], [0], [0], [1], [0, 0, 1, 1], [], []>} : vector<128x128xbf16>, vector<128x128xbf16>, vector<128x128xf32> -> vector<128x128xf32>
    %4 = vector.broadcast %2 : vector<1x128xf32> to vector<128x128xf32>
    %5 = arith.addf %3, %4 : vector<128x128xf32>
    %cst_5 = arith.constant 0.000000e+00 : f32
    %6 = vector.broadcast %cst_5 : f32 to vector<128x128xf32>
    %7 = arith.maximumf %5, %6 : vector<128x128xf32>
    %8 = arith.truncf %7 : vector<128x128xf32> to vector<128x128xbf16>
    %c0_6 = arith.constant 0 : index
    %c0_7 = arith.constant 0 : index
    %9 = vector.load %arg4[%c0_6, %c0_7] : memref<128x128xbf16, #tpu.memory_space<vmem>>, vector<128x128xbf16>
    %c0_8 = arith.constant 0 : index
    %c0_9 = arith.constant 0 : index
    %10 = vector.load %arg5[%c0_8, %c0_9] : memref<1x128xf32, #tpu.memory_space<vmem>>, vector<1x128xf32>
    %cst_10 = arith.constant dense<0.000000e+00> : vector<128x128xf32>
    %11 = tpu.matmul %8, %9, %cst_10 {dimension_numbers = #tpu.dot_dimension_numbers<[1], [0], [0], [1], [0, 0, 1, 1], [], []>} : vector<128x128xbf16>, vector<128x128xbf16>, vector<128x128xf32> -> vector<128x128xf32>
    %12 = vector.broadcast %10 : vector<1x128xf32> to vector<128x128xf32>
    %13 = arith.addf %11, %12 : vector<128x128xf32>
    %cst_11 = arith.constant 0.000000e+00 : f32
    %14 = vector.broadcast %cst_11 : f32 to vector<128x128xf32>
    %15 = arith.maximumf %13, %14 : vector<128x128xf32>
    %16 = arith.truncf %15 : vector<128x128xf32> to vector<128x128xbf16>
    %c0_12 = arith.constant 0 : index
    %c0_13 = arith.constant 0 : index
    %17 = vector.load %arg6[%c0_12, %c0_13] : memref<128x128xbf16, #tpu.memory_space<vmem>>, vector<128x128xbf16>
    %c0_14 = arith.constant 0 : index
    %c0_15 = arith.constant 0 : index
    %18 = vector.load %arg7[%c0_14, %c0_15] : memref<1x128xf32, #tpu.memory_space<vmem>>, vector<1x128xf32>
    %cst_16 = arith.constant dense<0.000000e+00> : vector<128x128xf32>
    %19 = tpu.matmul %16, %17, %cst_16 {dimension_numbers = #tpu.dot_dimension_numbers<[1], [0], [0], [1], [0, 0, 1, 1], [], []>} : vector<128x128xbf16>, vector<128x128xbf16>, vector<128x128xf32> -> vector<128x128xf32>
    %20 = vector.broadcast %18 : vector<1x128xf32> to vector<128x128xf32>
    %21 = arith.addf %19, %20 : vector<128x128xf32>
    %cst_17 = arith.constant 0.000000e+00 : f32
    %22 = vector.broadcast %cst_17 : f32 to vector<128x128xf32>
    %23 = arith.maximumf %21, %22 : vector<128x128xf32>
    %24 = arith.truncf %23 : vector<128x128xf32> to vector<128x128xbf16>
    %c0_18 = arith.constant 0 : index
    %c0_19 = arith.constant 0 : index
    %25 = vector.load %arg8[%c0_18, %c0_19] : memref<128x128xbf16, #tpu.memory_space<vmem>>, vector<128x128xbf16>
    %c0_20 = arith.constant 0 : index
    %c0_21 = arith.constant 0 : index
    %26 = vector.load %arg9[%c0_20, %c0_21] : memref<1x128xf32, #tpu.memory_space<vmem>>, vector<1x128xf32>
    %cst_22 = arith.constant dense<0.000000e+00> : vector<128x128xf32>
    %27 = tpu.matmul %24, %25, %cst_22 {dimension_numbers = #tpu.dot_dimension_numbers<[1], [0], [0], [1], [0, 0, 1, 1], [], []>} : vector<128x128xbf16>, vector<128x128xbf16>, vector<128x128xf32> -> vector<128x128xf32>
    %28 = vector.broadcast %26 : vector<1x128xf32> to vector<128x128xf32>
    %29 = arith.addf %27, %28 : vector<128x128xf32>
    %c0_23 = arith.constant 0 : index
    %c0_24 = arith.constant 0 : index
    %30 = vector.load %arg10[%c0_23, %c0_24] : memref<128x128xf32, #tpu.memory_space<vmem>>, vector<128x128xf32>
    tpu.vector_store %arg10[%c0_23, %c0_24], %29 {strides = array<i32>} : memref<128x128xf32, #tpu.memory_space<vmem>>, vector<128x128xf32>,
    return
  }
  func.func @transform_0(%arg0: i32) -> (i32, i32) {
    %c0_i32 = arith.constant 0 : i32
    %c0_i32_0 = arith.constant 0 : i32
    return %arg0, %c0_i32 : i32, i32
  }
  func.func @transform_1(%arg0: i32) -> (i32, i32) {
    %c0_i32 = arith.constant 0 : i32
    %c0_i32_0 = arith.constant 0 : i32
    %c0_i32_1 = arith.constant 0 : i32
    return %c0_i32, %c0_i32_0 : i32, i32
  }
  func.func @transform_2(%arg0: i32) -> (i32, i32) {
    %c0_i32 = arith.constant 0 : i32
    %c0_i32_0 = arith.constant 0 : i32
    %c0_i32_1 = arith.constant 0 : i32
    return %c0_i32, %c0_i32_0 : i32, i32
  }
  func.func @transform_3(%arg0: i32) -> (i32, i32) {
    %c0_i32 = arith.constant 0 : i32
    %c0_i32_0 = arith.constant 0 : i32
    %c0_i32_1 = arith.constant 0 : i32
    return %c0_i32, %c0_i32_0 : i32, i32
  }
  func.func @transform_4(%arg0: i32) -> (i32, i32) {
    %c0_i32 = arith.constant 0 : i32
    %c0_i32_0 = arith.constant 0 : i32
    %c0_i32_1 = arith.constant 0 : i32
    return %c0_i32, %c0_i32_0 : i32, i32
  }
  func.func @transform_5(%arg0: i32) -> (i32, i32) {
    %c0_i32 = arith.constant 0 : i32
    %c0_i32_0 = arith.constant 0 : i32
    %c0_i32_1 = arith.constant 0 : i32
    return %c0_i32, %c0_i32_0 : i32, i32
  }
  func.func @transform_6(%arg0: i32) -> (i32, i32) {
    %c0_i32 = arith.constant 0 : i32
    %c0_i32_0 = arith.constant 0 : i32
    %c0_i32_1 = arith.constant 0 : i32
    return %c0_i32, %c0_i32_0 : i32, i32
  }
  func.func @transform_7(%arg0: i32) -> (i32, i32) {
    %c0_i32 = arith.constant 0 : i32
    %c0_i32_0 = arith.constant 0 : i32
    %c0_i32_1 = arith.constant 0 : i32
    return %c0_i32, %c0_i32_0 : i32, i32
  }
  func.func @transform_8(%arg0: i32) -> (i32, i32) {
    %c0_i32 = arith.constant 0 : i32
    %c0_i32_0 = arith.constant 0 : i32
    %c0_i32_1 = arith.constant 0 : i32
    return %c0_i32, %c0_i32_0 : i32, i32
  }
  func.func @transform_9(%arg0: i32) -> (i32, i32) {
    %c0_i32 = arith.constant 0 : i32
    %c0_i32_0 = arith.constant 0 : i32
    return %arg0, %c0_i32 : i32, i32
  }
}

</mosaic_0001>

<bundles_post_ra>
// kernel: critic_forward.1
= control target key start
LH: loop header
LB: loop body
LE: loop exit
PB: predicated region body
PF: predicated region fallthrough
CT: control target
= control target key end

     0   :  { %14 = vsyncpa [#allocation3], 0  ;;  %s906_s12 = smov [#allocation2]   ;;  %s907_s14 = smov 64   ;;  %s1154_s0 = inlined_call_operand.vmem [shape: bf16[128,128], index: 0, kind: input, shape index: {}]   ;;  %s1155_s1 = inlined_call_operand.vmem [shape: bf16[128,128], index: 1, kind: input, shape index: {}]   ;;  %s1156_s2 = inlined_call_operand.vmem [shape: f32[1,128], index: 2, kind: input, shape index: {}]   ;;  %s1157_s3 = inlined_call_operand.vmem [shape: bf16[128,128], index: 3, kind: input, shape index: {}]   ;;  %s1158_s4 = inlined_call_operand.vmem [shape: f32[1,128], index: 4, kind: input, shape index: {}]   ;;  %s1159_s5 = inlined_call_operand.vmem [shape: bf16[128,128], index: 5, kind: input, shape index: {}]   ;;  %s1160_s6 = inlined_call_operand.vmem [shape: f32[1,128], index: 6, kind: input, shape index: {}]   ;;  %s1161_s7 = inlined_call_operand.hbm [shape: bf16[128,128], index: 7, kind: input, shape index: {}]   ;;  %s1162_s8 = inlined_call_operand.vmem [shape: f32[1,128], index: 8, kind: input, shape index: {}]   ;;  %s1163_s9 = inlined_call_operand.vmem [shape: f32[128,128], index: 9, kind: output, shape index: {}]  }
   0x1   :  { %s33_s11 = sshll.u32 %s1161_s7, 4  ;;  %s35_s13 = sshll.u32 %s906_s12, 4  ;;  %s34_s11 = int_to_ptr.hbm [resolvable:$true] %s33_s11  ;;  %s36_s13 = int_to_ptr.vmem [resolvable:$true] %s35_s13 }
   0x2   :  { %s908_s15 = smov 4  }
   0x3   :  { %41 = dma.hbm_to_vmem [thread:$0]  %s34_s11, 1024, %s36_s13, [#allocation3], %s907_s14, %s907_s14, %s908_s15  }
   0x4   :  { %904 = dma.done.wait [#allocation3], 1024  }
   0x5   :  { %905 = vsyncadd [#allocation3], 4294966272  ;;  %v848_v0 = vld [vmem:[%s1155_s1 + $0x38] sm:$0xff]  ;;  %v847_v1 = vld [vmem:[%s1155_s1 + $0x30] sm:$0xff] }
   0x6   :  { %180 = vmatpush.bf16.msra.mxu0 %v848_v0  ;;  %v846_v2 = vld [vmem:[%s1155_s1 + $0x28] sm:$0xff]  ;;  %v845_v3 = vld [vmem:[%s1155_s1 + $0x20] sm:$0xff]  ;;  %v844_v4 = vld [vmem:[%s1155_s1 + $0x18] sm:$0xff] }
   0x7   :  { %v843_v5 = vld [vmem:[%s1155_s1 + $0x10] sm:$0xff]  ;;  %v842_v6 = vld [vmem:[%s1155_s1 + $0x8] sm:$0xff]  ;;  %v841_v7 = vld [vmem:[%s1155_s1] sm:$0xff] }
   0x8   :  { %v833_v8 = vld [vmem:[%s1154_s0] sm:$0xff]  ;;  %v834_v9 = vld [vmem:[%s1154_s0 + $0x8] sm:$0xff]  ;;  %v835_v10 = vld [vmem:[%s1154_s0 + $0x10] sm:$0xff] }
   0x9   :  { %v836_v11 = vld [vmem:[%s1154_s0 + $0x18] sm:$0xff]  ;;  %v837_v12 = vld [vmem:[%s1154_s0 + $0x20] sm:$0xff]  ;;  %v838_v14 = vld [vmem:[%s1154_s0 + $0x28] sm:$0xff] }
   0xa   :  { %181 = vmatpush.bf16.msra.mxu0 %v847_v1  ;;  %v856_v13 = vld [vmem:[%s1157_s3 + $0x38] sm:$0xff]  ;;  %v855_v15 = vld [vmem:[%s1157_s3 + $0x30] sm:$0xff]  ;;  %v854_v16 = vld [vmem:[%s1157_s3 + $0x28] sm:$0xff] }
   0xb   :  { %321 = vmatpush.bf16.msra.mxu1 %v856_v13  ;;  %v853_v17 = vld [vmem:[%s1157_s3 + $0x20] sm:$0xff]  ;;  %v852_v18 = vld [vmem:[%s1157_s3 + $0x18] sm:$0xff]  ;;  %v839_v19 = vld [vmem:[%s1154_s0 + $0x30] sm:$0xff] }
   0xc   :  { %v851_v20 = vld [vmem:[%s1157_s3 + $0x10] sm:$0xff]  ;;  %v850_v21 = vld [vmem:[%s1157_s3 + $0x8] sm:$0xff]  ;;  %v849_v22 = vld [vmem:[%s1157_s3] sm:$0xff] }
   0xd   :  { %v840_v23 = vld [vmem:[%s1154_s0 + $0x38] sm:$0xff]  ;;  %v1037_v25 = vld [vmem:[%s1156_s2] ss:$0 sm:$0xff] }
   0xe   :  { %182 = vmatpush.bf16.msra.mxu0 %v846_v2  ;;  %v864_v0 = vld [vmem:[%s1159_s5 + $0x38] sm:$0xff] }
   0xf   :  { %322 = vmatpush.bf16.msra.mxu1 %v855_v15  ;;  %462 = vmatpush.bf16.msra.mxu2 %v864_v0  ;;  %v859_v15 = vld [vmem:[%s1159_s5 + $0x10] sm:$0xff] }
  0x12   :  { %183 = vmatpush.bf16.msra.mxu0 %v845_v3 }
  0x13   :  { %323 = vmatpush.bf16.msra.mxu1 %v854_v16 }
  0x16   :  { %184 = vmatpush.bf16.msra.mxu0 %v844_v4  ;;  %v863_v4 = vld [vmem:[%s1159_s5 + $0x30] sm:$0xff] }
  0x17   :  { %324 = vmatpush.bf16.msra.mxu1 %v853_v17  ;;  %463 = vmatpush.bf16.msra.mxu2 %v863_v4  ;;  %v858_v17 = vld [vmem:[%s1159_s5 + $0x8] sm:$0xff]  ;;  %v872_v4 = vld [vmem:[#allocation2 + $0x38] sm:$0xff] }
  0x18   :  { %603 = vmatpush.bf16.msra.mxu3 %v872_v4 }
  0x1a   :  { %185 = vmatpush.bf16.msra.mxu0 %v843_v5 }
  0x1b   :  { %325 = vmatpush.bf16.msra.mxu1 %v852_v18  ;;  %v857_v18 = vld [vmem:[%s1159_s5] sm:$0xff] }
  0x1e   :  { %186 = vmatpush.bf16.msra.mxu0 %v842_v6  ;;  %v862_v6 = vld [vmem:[%s1159_s5 + $0x28] sm:$0xff] }
  0x1f   :  { %326 = vmatpush.bf16.msra.mxu1 %v851_v20  ;;  %464 = vmatpush.bf16.msra.mxu2 %v862_v6  ;;  %v871_v6 = vld [vmem:[#allocation2 + $0x30] sm:$0xff] }
  0x20   :  { %604 = vmatpush.bf16.msra.mxu3 %v871_v6 }
  0x22   :  { %187 = vmatpush.bf16.msra.mxu0 %v841_v7  ;;  %v861_v7 = vld [vmem:[%s1159_s5 + $0x20] sm:$0xff] }
  0x23   :  { %327 = vmatpush.bf16.msra.mxu1 %v850_v21  ;;  %465 = vmatpush.bf16.msra.mxu2 %v861_v7  ;;  %v870_v7 = vld [vmem:[#allocation2 + $0x28] sm:$0xff] }
  0x24   :  { %605 = vmatpush.bf16.msra.mxu3 %v870_v7 }
  0x25   :  { %188 = vmatmul.bf16.vlgmr.msra.gmra.mxu0 %v833_v8 }
  0x27   :  { %328 = vmatpush.bf16.msra.mxu1 %v849_v22 }
  0x35   :  { %193 = vmatmul.bf16.gmra.mxu0 %v834_v9 }
  0x45   :  { %198 = vmatmul.bf16.gmra.mxu0 %v835_v10 }
  0x55   :  { %203 = vmatmul.bf16.gmra.mxu0 %v836_v11  ;;  %v860_v11 = vld [vmem:[%s1159_s5 + $0x18] sm:$0xff] }
  0x56   :  { %466 = vmatpush.bf16.msra.mxu2 %v860_v11  ;;  %v869_v11 = vld [vmem:[#allocation2 + $0x20] sm:$0xff] }
  0x57   :  { %606 = vmatpush.bf16.msra.mxu3 %v869_v11 }
  0x5a   :  { %467 = vmatpush.bf16.msra.mxu2 %v859_v15 }
  0x5e   :  { %468 = vmatpush.bf16.msra.mxu2 %v858_v17  ;;  %v867_v17 = vld [vmem:[#allocation2 + $0x10] sm:$0xff] }
  0x62   :  { %469 = vmatpush.bf16.msra.mxu2 %v857_v18 }
  0x65   :  { %208 = vmatmul.bf16.gmra.mxu0 %v837_v12 }
  0x75   :  { %213 = vmatmul.bf16.gmra.mxu0 %v838_v14 }
  0x85   :  { %218 = vmatmul.bf16.gmra.mxu0 %v839_v19 }
  0x95   :  { %223 = vmatmul.bf16.gmra.mxu0 %v840_v23 }
  0xa2   :  { %v189_v24 = vpop.f32.mrf.mxu0 }
  0xa3   :  { %v190_v26 = vadd.f32 %v1037_v25, %v189_v24 }
  0xa5   :  { %v229_v29 = vmax.f32 %v190_v26, 0.0 }
  0xaa   :  { %v191_v27 = vpop.f32.mrf.mxu0 }
  0xab   :  { %v192_v28 = vadd.f32 %v1037_v25, %v191_v27  ;;  %v1082_v27 = vld [vmem:[%s1158_s4] ss:$0 sm:$0xff] }
  0xad   :  { %v230_v30 = vmax.f32 %v192_v28, 0.0 }
  0xaf   :  { %v245_v31 = vpack.c.bf16 %v230_v30, %v229_v29 }
  0xb1   :  { %329 = vmatmul.bf16.vlgmr.msra.gmra.mxu1 %v245_v31 }
  0xb2   :  { %v194_v32 = vpop.f32.mrf.mxu0 }
  0xb3   :  { %v195_v33 = vadd.f32 %v1037_v25, %v194_v32 }
  0xb5   :  { %v231_v36 = vmax.f32 %v195_v33, 0.0 }
  0xba   :  { %v196_v34 = vpop.f32.mrf.mxu0 }
  0xbb   :  { %v197_v35 = vadd.f32 %v1037_v25, %v196_v34 }
  0xbd   :  { %v232_v37 = vmax.f32 %v197_v35, 0.0 }
  0xbf   :  { %v246_v38 = vpack.c.bf16 %v232_v37, %v231_v36 }
  0xc1   :  { %334 = vmatmul.bf16.gmra.mxu1 %v246_v38 }
  0xc2   :  { %v199_v39 = vpop.f32.mrf.mxu0 }
  0xc3   :  { %v200_v40 = vadd.f32 %v1037_v25, %v199_v39 }
  0xc5   :  { %v233_v43 = vmax.f32 %v200_v40, 0.0 }
  0xca   :  { %v201_v41 = vpop.f32.mrf.mxu0 }
  0xcb   :  { %v202_v42 = vadd.f32 %v1037_v25, %v201_v41 }
  0xcd   :  { %v234_v44 = vmax.f32 %v202_v42, 0.0 }
  0xcf   :  { %v247_v45 = vpack.c.bf16 %v234_v44, %v233_v43 }
  0xd1   :  { %339 = vmatmul.bf16.gmra.mxu1 %v247_v45 }
  0xd2   :  { %v204_v46 = vpop.f32.mrf.mxu0 }
  0xd3   :  { %v205_v47 = vadd.f32 %v1037_v25, %v204_v46 }
  0xd5   :  { %v235_v50 = vmax.f32 %v205_v47, 0.0 }
  0xda   :  { %v206_v48 = vpop.f32.mrf.mxu0 }
  0xdb   :  { %v207_v49 = vadd.f32 %v1037_v25, %v206_v48 }
  0xdd   :  { %v236_v51 = vmax.f32 %v207_v49, 0.0 }
  0xdf   :  { %v248_v52 = vpack.c.bf16 %v236_v51, %v235_v50 }
  0xe1   :  { %344 = vmatmul.bf16.gmra.mxu1 %v248_v52 }
  0xe2   :  { %v209_v53 = vpop.f32.mrf.mxu0 }
  0xe3   :  { %v210_v54 = vadd.f32 %v1037_v25, %v209_v53 }
  0xe5   :  { %v237_v57 = vmax.f32 %v210_v54, 0.0 }
  0xea   :  { %v211_v55 = vpop.f32.mrf.mxu0 }
  0xeb   :  { %v212_v56 = vadd.f32 %v1037_v25, %v211_v55 }
  0xed   :  { %v238_v58 = vmax.f32 %v212_v56, 0.0 }
  0xef   :  { %v249_v59 = vpack.c.bf16 %v238_v58, %v237_v57 }
  0xf1   :  { %349 = vmatmul.bf16.gmra.mxu1 %v249_v59 }
  0xf2   :  { %v214_v60 = vpop.f32.mrf.mxu0 }
  0xf3   :  { %v215_v61 = vadd.f32 %v1037_v25, %v214_v60 }
  0xf5   :  { %v239_v1 = vmax.f32 %v215_v61, 0.0 }
  0xfa   :  { %v216_v62 = vpop.f32.mrf.mxu0 }
  0xfb   :  { %v217_v63 = vadd.f32 %v1037_v25, %v216_v62 }
  0xfd   :  { %v240_v2 = vmax.f32 %v217_v63, 0.0 }
  0xff   :  { %v250_v3 = vpack.c.bf16 %v240_v2, %v239_v1 }
 0x101   :  { %354 = vmatmul.bf16.gmra.mxu1 %v250_v3 }
 0x102   :  { %v219_v5 = vpop.f32.mrf.mxu0 }
 0x103   :  { %v220_v8 = vadd.f32 %v1037_v25, %v219_v5 }
 0x105   :  { %v241_v12 = vmax.f32 %v220_v8, 0.0 }
 0x10a   :  { %v221_v9 = vpop.f32.mrf.mxu0 }
 0x10b   :  { %v222_v10 = vadd.f32 %v1037_v25, %v221_v9 }
 0x10d   :  { %v242_v13 = vmax.f32 %v222_v10, 0.0 }
 0x10f   :  { %v251_v14 = vpack.c.bf16 %v242_v13, %v241_v12 }
 0x111   :  { %359 = vmatmul.bf16.gmra.mxu1 %v251_v14 }
 0x112   :  { %v224_v16 = vpop.f32.mrf.mxu0 }
 0x113   :  { %v225_v19 = vadd.f32 %v1037_v25, %v224_v16  ;;  %v868_v16 = vld [vmem:[#allocation2 + $0x18] sm:$0xff] }
 0x114   :  { %607 = vmatpush.bf16.msra.mxu3 %v868_v16 }
 0x115   :  { %v243_v22 = vmax.f32 %v225_v19, 0.0 }
 0x118   :  { %608 = vmatpush.bf16.msra.mxu3 %v867_v17 }
 0x11a   :  { %v226_v20 = vpop.f32.mrf.mxu0 }
 0x11b   :  { %v227_v21 = vadd.f32 %v1037_v25, %v226_v20  ;;  %v866_v20 = vld [vmem:[#allocation2 + $0x8] sm:$0xff] }
 0x11c   :  { %609 = vmatpush.bf16.msra.mxu3 %v866_v20 }
 0x11d   :  { %v244_v23 = vmax.f32 %v227_v21, 0.0 }
 0x11f   :  { %v252_v24 = vpack.c.bf16 %v244_v23, %v243_v22 }
 0x121   :  { %364 = vmatmul.bf16.gmra.mxu1 %v252_v24  ;;  %v865_v24 = vld [vmem:[#allocation2] sm:$0xff] }
 0x122   :  { %610 = vmatpush.bf16.msra.mxu3 %v865_v24 }
 0x12e   :  { %v330_v26 = vpop.f32.mrf.mxu1 }
 0x12f   :  { %v331_v28 = vadd.f32 %v1082_v27, %v330_v26 }
 0x131   :  { %v370_v31 = vmax.f32 %v331_v28, 0.0 }
 0x136   :  { %v332_v29 = vpop.f32.mrf.mxu1 }
 0x137   :  { %v333_v30 = vadd.f32 %v1082_v27, %v332_v29  ;;  %v878_v29 = vld [vmem:[%s1160_s6] ss:$0 sm:$0xff] }
 0x139   :  { %v371_v32 = vmax.f32 %v333_v30, 0.0 }
 0x13b   :  { %v386_v33 = vpack.c.bf16 %v371_v32, %v370_v31 }
 0x13d   :  { %470 = vmatmul.bf16.vlgmr.msra.gmra.mxu2 %v386_v33 }
 0x13e   :  { %v335_v25 = vpop.f32.mrf.mxu1 }
 0x13f   :  { %v336_v34 = vadd.f32 %v1082_v27, %v335_v25 }
 0x141   :  { %v372_v37 = vmax.f32 %v336_v34, 0.0 }
 0x146   :  { %v337_v35 = vpop.f32.mrf.mxu1 }
 0x147   :  { %v338_v36 = vadd.f32 %v1082_v27, %v337_v35 }
 0x149   :  { %v373_v38 = vmax.f32 %v338_v36, 0.0 }
 0x14b   :  { %v387_v39 = vpack.c.bf16 %v373_v38, %v372_v37 }
 0x14d   :  { %475 = vmatmul.bf16.gmra.mxu2 %v387_v39 }
 0x14e   :  { %v340_v40 = vpop.f32.mrf.mxu1 }
 0x14f   :  { %v341_v41 = vadd.f32 %v1082_v27, %v340_v40 }
 0x151   :  { %v374_v44 = vmax.f32 %v341_v41, 0.0 }
 0x156   :  { %v342_v42 = vpop.f32.mrf.mxu1 }
 0x157   :  { %v343_v43 = vadd.f32 %v1082_v27, %v342_v42 }
 0x159   :  { %v375_v45 = vmax.f32 %v343_v43, 0.0 }
 0x15b   :  { %v388_v46 = vpack.c.bf16 %v375_v45, %v374_v44 }
 0x15d   :  { %480 = vmatmul.bf16.gmra.mxu2 %v388_v46 }
 0x15e   :  { %v345_v47 = vpop.f32.mrf.mxu1 }
 0x15f   :  { %v346_v48 = vadd.f32 %v1082_v27, %v345_v47 }
 0x161   :  { %v376_v51 = vmax.f32 %v346_v48, 0.0 }
 0x166   :  { %v347_v49 = vpop.f32.mrf.mxu1 }
 0x167   :  { %v348_v50 = vadd.f32 %v1082_v27, %v347_v49 }
 0x169   :  { %v377_v52 = vmax.f32 %v348_v50, 0.0 }
 0x16b   :  { %v389_v53 = vpack.c.bf16 %v377_v52, %v376_v51 }
 0x16d   :  { %485 = vmatmul.bf16.gmra.mxu2 %v389_v53 }
 0x16e   :  { %v350_v54 = vpop.f32.mrf.mxu1 }
 0x16f   :  { %v351_v55 = vadd.f32 %v1082_v27, %v350_v54 }
 0x171   :  { %v378_v58 = vmax.f32 %v351_v55, 0.0 }
 0x176   :  { %v352_v56 = vpop.f32.mrf.mxu1 }
 0x177   :  { %v353_v57 = vadd.f32 %v1082_v27, %v352_v56 }
 0x179   :  { %v379_v59 = vmax.f32 %v353_v57, 0.0 }
 0x17b   :  { %v390_v60 = vpack.c.bf16 %v379_v59, %v378_v58 }
 0x17d   :  { %490 = vmatmul.bf16.gmra.mxu2 %v390_v60 }
 0x17e   :  { %v355_v61 = vpop.f32.mrf.mxu1 }
 0x17f   :  { %v356_v62 = vadd.f32 %v1082_v27, %v355_v61 }
 0x181   :  { %v380_v1 = vmax.f32 %v356_v62, 0.0 }
 0x186   :  { %v357_v63 = vpop.f32.mrf.mxu1 }
 0x187   :  { %v358_v0 = vadd.f32 %v1082_v27, %v357_v63 }
 0x189   :  { %v381_v2 = vmax.f32 %v358_v0, 0.0 }
 0x18b   :  { %v391_v3 = vpack.c.bf16 %v381_v2, %v380_v1 }
 0x18d   :  { %495 = vmatmul.bf16.gmra.mxu2 %v391_v3 }
 0x18e   :  { %v360_v5 = vpop.f32.mrf.mxu1 }
 0x18f   :  { %v361_v8 = vadd.f32 %v1082_v27, %v360_v5 }
 0x191   :  { %v382_v12 = vmax.f32 %v361_v8, 0.0 }
 0x196   :  { %v362_v9 = vpop.f32.mrf.mxu1 }
 0x197   :  { %v363_v10 = vadd.f32 %v1082_v27, %v362_v9 }
 0x199   :  { %v383_v13 = vmax.f32 %v363_v10, 0.0 }
 0x19b   :  { %v392_v14 = vpack.c.bf16 %v383_v13, %v382_v12 }
 0x19d   :  { %500 = vmatmul.bf16.gmra.mxu2 %v392_v14 }
 0x19e   :  { %v365_v15 = vpop.f32.mrf.mxu1 }
 0x19f   :  { %v366_v18 = vadd.f32 %v1082_v27, %v365_v15 }
 0x1a1   :  { %v384_v22 = vmax.f32 %v366_v18, 0.0 }
 0x1a6   :  { %v367_v19 = vpop.f32.mrf.mxu1 }
 0x1a7   :  { %v368_v21 = vadd.f32 %v1082_v27, %v367_v19  ;;  %v879_v19 = vld [vmem:[%s1162_s8] ss:$0 sm:$0xff] }
 0x1a9   :  { %v385_v23 = vmax.f32 %v368_v21, 0.0 }
 0x1ab   :  { %v393_v26 = vpack.c.bf16 %v385_v23, %v384_v22 }
 0x1ad   :  { %505 = vmatmul.bf16.gmra.mxu2 %v393_v26 }
 0x1c0   :  { %v471_v28 = vpop.f32.mrf.mxu2 }
 0x1c1   :  { %v472_v30 = vadd.f32 %v878_v29, %v471_v28 }
 0x1c3   :  { %v511_v33 = vmax.f32 %v472_v30, 0.0 }
 0x1c8   :  { %v473_v31 = vpop.f32.mrf.mxu2 }
 0x1c9   :  { %v474_v32 = vadd.f32 %v878_v29, %v473_v31 }
 0x1cb   :  { %v512_v25 = vmax.f32 %v474_v32, 0.0 }
 0x1cd   :  { %v527_v34 = vpack.c.bf16 %v512_v25, %v511_v33 }
 0x1cf   :  { %611 = vmatmul.bf16.vlgmr.msra.gmra.mxu3 %v527_v34 }
 0x1d0   :  { %v476_v27 = vpop.f32.mrf.mxu2 }
 0x1d1   :  { %v477_v35 = vadd.f32 %v878_v29, %v476_v27 }
 0x1d3   :  { %v513_v38 = vmax.f32 %v477_v35, 0.0 }
 0x1d8   :  { %v478_v36 = vpop.f32.mrf.mxu2 }
 0x1d9   :  { %v479_v37 = vadd.f32 %v878_v29, %v478_v36 }
 0x1db   :  { %v514_v39 = vmax.f32 %v479_v37, 0.0 }
 0x1dd   :  { %v528_v40 = vpack.c.bf16 %v514_v39, %v513_v38 }
 0x1df   :  { %616 = vmatmul.bf16.gmra.mxu3 %v528_v40 }
 0x1e0   :  { %v481_v41 = vpop.f32.mrf.mxu2 }
 0x1e1   :  { %v482_v42 = vadd.f32 %v878_v29, %v481_v41 }
 0x1e3   :  { %v515_v45 = vmax.f32 %v482_v42, 0.0 }
 0x1e8   :  { %v483_v43 = vpop.f32.mrf.mxu2 }
 0x1e9   :  { %v484_v44 = vadd.f32 %v878_v29, %v483_v43 }
 0x1eb   :  { %v516_v46 = vmax.f32 %v484_v44, 0.0 }
 0x1ed   :  { %v529_v47 = vpack.c.bf16 %v516_v46, %v515_v45 }
 0x1ef   :  { %621 = vmatmul.bf16.gmra.mxu3 %v529_v47 }
 0x1f0   :  { %v486_v48 = vpop.f32.mrf.mxu2 }
 0x1f1   :  { %v487_v49 = vadd.f32 %v878_v29, %v486_v48 }
 0x1f3   :  { %v517_v52 = vmax.f32 %v487_v49, 0.0 }
 0x1f8   :  { %v488_v50 = vpop.f32.mrf.mxu2 }
 0x1f9   :  { %v489_v51 = vadd.f32 %v878_v29, %v488_v50 }
 0x1fb   :  { %v518_v53 = vmax.f32 %v489_v51, 0.0 }
 0x1fd   :  { %v530_v54 = vpack.c.bf16 %v518_v53, %v517_v52 }
 0x1ff   :  { %626 = vmatmul.bf16.gmra.mxu3 %v530_v54 }
 0x200   :  { %v491_v55 = vpop.f32.mrf.mxu2 }
 0x201   :  { %v492_v56 = vadd.f32 %v878_v29, %v491_v55 }
 0x203   :  { %v519_v59 = vmax.f32 %v492_v56, 0.0 }
 0x208   :  { %v493_v57 = vpop.f32.mrf.mxu2 }
 0x209   :  { %v494_v58 = vadd.f32 %v878_v29, %v493_v57 }
 0x20b   :  { %v520_v60 = vmax.f32 %v494_v58, 0.0 }
 0x20d   :  { %v531_v61 = vpack.c.bf16 %v520_v60, %v519_v59 }
 0x20f   :  { %631 = vmatmul.bf16.gmra.mxu3 %v531_v61 }
 0x210   :  { %v496_v62 = vpop.f32.mrf.mxu2 }
 0x211   :  { %v497_v63 = vadd.f32 %v878_v29, %v496_v62 }
 0x213   :  { %v521_v2 = vmax.f32 %v497_v63, 0.0 }
 0x218   :  { %v498_v0 = vpop.f32.mrf.mxu2 }
 0x219   :  { %v499_v1 = vadd.f32 %v878_v29, %v498_v0 }
 0x21b   :  { %v522_v3 = vmax.f32 %v499_v1, 0.0 }
 0x21d   :  { %v532_v4 = vpack.c.bf16 %v522_v3, %v521_v2 }
 0x21f   :  { %636 = vmatmul.bf16.gmra.mxu3 %v532_v4 }
 0x220   :  { %v501_v5 = vpop.f32.mrf.mxu2 }
 0x221   :  { %v502_v6 = vadd.f32 %v878_v29, %v501_v5 }
 0x223   :  { %v523_v9 = vmax.f32 %v502_v6, 0.0 }
 0x228   :  { %v503_v7 = vpop.f32.mrf.mxu2 }
 0x229   :  { %v504_v8 = vadd.f32 %v878_v29, %v503_v7 }
 0x22b   :  { %v524_v10 = vmax.f32 %v504_v8, 0.0 }
 0x22d   :  { %v533_v11 = vpack.c.bf16 %v524_v10, %v523_v9 }
 0x22f   :  { %641 = vmatmul.bf16.gmra.mxu3 %v533_v11 }
 0x230   :  { %v506_v12 = vpop.f32.mrf.mxu2 }
 0x231   :  { %v507_v13 = vadd.f32 %v878_v29, %v506_v12 }
 0x233   :  { %v525_v16 = vmax.f32 %v507_v13, 0.0 }
 0x238   :  { %v508_v14 = vpop.f32.mrf.mxu2 }
 0x239   :  { %v509_v15 = vadd.f32 %v878_v29, %v508_v14 }
 0x23b   :  { %v526_v17 = vmax.f32 %v509_v15, 0.0 }
 0x23d   :  { %v534_v18 = vpack.c.bf16 %v526_v17, %v525_v16 }
 0x23f   :  { %646 = vmatmul.bf16.gmra.mxu3 %v534_v18 }
 0x252   :  { %v612_v20 = vpop.f32.mrf.mxu3 }
 0x253   :  { %v613_v21 = vadd.f32 %v879_v19, %v612_v20 }
 0x255   :  { %652 = vst [vmem:[%s1163_s9] sm:$0xff] %v613_v21 }
 0x25a   :  { %v614_v22 = vpop.f32.mrf.mxu3 }
 0x25b   :  { %v615_v23 = vadd.f32 %v879_v19, %v614_v22 }
 0x25d   :  { %653 = vst [vmem:[%s1163_s9 + $0x8] sm:$0xff] %v615_v23 }
 0x262   :  { %v617_v24 = vpop.f32.mrf.mxu3 }
 0x263   :  { %v618_v26 = vadd.f32 %v879_v19, %v617_v24 }
 0x265   :  { %654 = vst [vmem:[%s1163_s9 + $0x10] sm:$0xff] %v618_v26 }
 0x26a   :  { %v619_v28 = vpop.f32.mrf.mxu3 }
 0x26b   :  { %v620_v29 = vadd.f32 %v879_v19, %v619_v28 }
 0x26d   :  { %655 = vst [vmem:[%s1163_s9 + $0x18] sm:$0xff] %v620_v29 }
 0x272   :  { %v622_v30 = vpop.f32.mrf.mxu3 }
 0x273   :  { %v623_v31 = vadd.f32 %v879_v19, %v622_v30 }
 0x275   :  { %656 = vst [vmem:[%s1163_s9 + $0x20] sm:$0xff] %v623_v31 }
 0x27a   :  { %v624_v32 = vpop.f32.mrf.mxu3 }
 0x27b   :  { %v625_v33 = vadd.f32 %v879_v19, %v624_v32 }
 0x27d   :  { %657 = vst [vmem:[%s1163_s9 + $0x28] sm:$0xff] %v625_v33 }
 0x282   :  { %v627_v25 = vpop.f32.mrf.mxu3 }
 0x283   :  { %v628_v34 = vadd.f32 %v879_v19, %v627_v25 }
 0x285   :  { %658 = vst [vmem:[%s1163_s9 + $0x30] sm:$0xff] %v628_v34 }
 0x28a   :  { %v629_v27 = vpop.f32.mrf.mxu3 }
 0x28b   :  { %v630_v35 = vadd.f32 %v879_v19, %v629_v27 }
 0x28d   :  { %659 = vst [vmem:[%s1163_s9 + $0x38] sm:$0xff] %v630_v35 }
 0x292   :  { %v632_v36 = vpop.f32.mrf.mxu3 }
 0x293   :  { %v633_v37 = vadd.f32 %v879_v19, %v632_v36 }
 0x295   :  { %660 = vst [vmem:[%s1163_s9 + $0x40] sm:$0xff] %v633_v37 }
 0x29a   :  { %v634_v38 = vpop.f32.mrf.mxu3 }
 0x29b   :  { %v635_v39 = vadd.f32 %v879_v19, %v634_v38 }
 0x29d   :  { %661 = vst [vmem:[%s1163_s9 + $0x48] sm:$0xff] %v635_v39 }
 0x2a2   :  { %v637_v40 = vpop.f32.mrf.mxu3 }
 0x2a3   :  { %v638_v41 = vadd.f32 %v879_v19, %v637_v40 }
 0x2a5   :  { %662 = vst [vmem:[%s1163_s9 + $0x50] sm:$0xff] %v638_v41 }
 0x2aa   :  { %v639_v42 = vpop.f32.mrf.mxu3 }
 0x2ab   :  { %v640_v43 = vadd.f32 %v879_v19, %v639_v42 }
 0x2ad   :  { %663 = vst [vmem:[%s1163_s9 + $0x58] sm:$0xff] %v640_v43 }
 0x2b2   :  { %v642_v44 = vpop.f32.mrf.mxu3 }
 0x2b3   :  { %v643_v45 = vadd.f32 %v879_v19, %v642_v44 }
 0x2b5   :  { %664 = vst [vmem:[%s1163_s9 + $0x60] sm:$0xff] %v643_v45 }
 0x2ba   :  { %v644_v46 = vpop.f32.mrf.mxu3 }
 0x2bb   :  { %v645_v47 = vadd.f32 %v879_v19, %v644_v46 }
 0x2bd   :  { %665 = vst [vmem:[%s1163_s9 + $0x68] sm:$0xff] %v645_v47 }
 0x2c2   :  { %v647_v48 = vpop.f32.mrf.mxu3 }
 0x2c3   :  { %v648_v49 = vadd.f32 %v879_v19, %v647_v48 }
 0x2c5   :  { %666 = vst [vmem:[%s1163_s9 + $0x70] sm:$0xff] %v648_v49 }
 0x2ca   :  { %v649_v50 = vpop.f32.mrf.mxu3 }
 0x2cb   :  { %v650_v51 = vadd.f32 %v879_v19, %v649_v50 }
 0x2cd   :  { %667 = vst [vmem:[%s1163_s9 + $0x78] sm:$0xff] %v650_v51 }
 0x2ce   :  { %672 = vsyncpa [#allocation3], 1 }

</bundles_post_ra>
